<compile_context>
chip_gen: v6e
topology: v6e:2x2x1
jax: 0.10.0
libtpu: 0.0.40
codegen_flags: <defaults>
</compile_context>

<pallas_src>
import jax
import jax.numpy as jnp
from jax.experimental import pallas as pl
from jax.experimental.pallas import tpu as pltpu


# ----------------------------------------------------------------------------- helpers
def _interp_matrix_1d(out_size: int, in_size: int) -> jnp.ndarray:
    """Bilinear interpolation matrix (align_corners=True), shape (out_size, in_size)."""
    if out_size == 1:
        src = jnp.zeros((1,), dtype=jnp.float32)
    else:
        src = jnp.arange(out_size, dtype=jnp.float32) * (in_size - 1) / (out_size - 1)
    i0 = jnp.clip(jnp.floor(src).astype(jnp.int32), 0, in_size - 1)
    i1 = jnp.clip(i0 + 1, 0, in_size - 1)
    frac = src - i0.astype(jnp.float32)
    rows = jnp.arange(out_size)
    m = jnp.zeros((out_size, in_size), dtype=jnp.float32)
    m = m.at[rows, i0].add(1.0 - frac)
    m = m.at[rows, i1].add(frac)
    return m


def _pick_tile(total: int, max_tile: int, multiple: int) -> int:
    """Largest divisor of `total` <= max_tile that is a multiple of `multiple`.
    Falls back to `total` (full dim, always BlockSpec-legal).  NOTE: the fallback can
    produce a large block, so callers budget VMEM before calling."""
    max_tile = max(1, min(total, max_tile))
    best = None
    for d in range(1, max_tile + 1):
        if total % d == 0 and d % multiple == 0:
            best = d
    return best if best is not None else total


def _vmem_limit_bytes() -> int:
    """Per-generation VMEM request: ~45% of physical capacity (v7x 64 MiB -> ~28 MiB,
    v5e/v6e 128 MiB -> ~57 MiB), clamped to sane bounds."""
    cap = 64 * 1024 * 1024
    try:
        info = pltpu.get_tpu_info()
        cap = int(getattr(info, "vmem_capacity_bytes", cap)) or cap
    except Exception:
        pass
    return max(16 * 1024 * 1024, min((cap * 45) // 100, 96 * 1024 * 1024))


# ----------------------------------------------------------------------------- kernels
def _conv1x1_kernel(g_ref, w_ref, b_ref, o_ref):
    # g_ref: (1, Cin, tS) native dtype; w_ref: (Cout, Cin); b_ref: (Cout, 1)
    # o_ref: (1, Cout, tS) output dtype.  Cast to f32 on the VPU (free), MXU matmul.
    y = jnp.dot(w_ref[...].astype(jnp.float32), g_ref[0].astype(jnp.float32),
                preferred_element_type=jnp.float32)                  # (Cout, tS)
    o_ref[0] = (y + b_ref[...].astype(jnp.float32)).astype(o_ref.dtype)


def _resize_add_kernel(y_ref, ih_ref, iwt_ref, f_ref, o_ref):
    # y_ref:   (1, Cout, Hg, Wg)  coarse conv output (VMEM-resident across Hf tiles)
    # ih_ref:  (tHf, Hg)          this tile's rows of the H interpolation matrix
    # iwt_ref: (Wg, Wf)           transposed W interpolation matrix (resident)
    # f_ref/o_ref: (1, Cout, tHf, Wf)  residual / output tile (lane-dense Wf)
    cout = y_ref.shape[1]
    thf = ih_ref.shape[0]
    wf = iwt_ref.shape[1]
    ih = ih_ref[...]
    # H-resize: per-channel (tHf,Hg)@(Hg,Wg) dots -- interp rows reused from registers,
    # no broadcast_to materialization (kills the vreg-spilling copy from v1).
    q2d = jnp.concatenate(
        [jnp.dot(ih, y_ref[0, c].astype(jnp.float32),
                 preferred_element_type=jnp.float32) for c in range(cout)],
        axis=0)                                                       # (Cout*tHf, Wg)
    # W-resize: ONE (Cout*tHf, Wg) @ (Wg, Wf) MXU matmul with a lane-dense output.
    z = jnp.dot(q2d, iwt_ref[...],
                preferred_element_type=jnp.float32).reshape(cout, thf, wf)
    o_ref[0] = (z + f_ref[0].astype(jnp.float32)).astype(o_ref.dtype)


# ----------------------------------------------------------------------------- wrapper
def hlayer_forward(g_nchw, f_nchw, conv_weight, conv_bias,
                   *, s_tile_max=65536, hf_tile_max=512):
    """g_nchw: (N, Cin, Hg, Wg); f_nchw: (N, Cout, Hf, Wf).
    conv_weight: (Cout, Cin, 1, 1); conv_bias: (Cout,).
    Returns (N, Cout, Hf, Wf) with dtype == f_nchw.dtype."""
    N, Cin, Hg, Wg = g_nchw.shape
    Nf, Cout, Hf, Wf = f_nchw.shape
    assert Nf == N, "batch mismatch between inputPrevG and inputF"
    Sg = Hg * Wg

    out_dtype = f_nchw.dtype
    y_dtype = out_dtype          # intermediate follows output dtype (bf16 stays bf16)
    gsz = g_nchw.dtype.itemsize
    fsz = f_nchw.dtype.itemsize
    ysz = jnp.zeros((), y_dtype).dtype.itemsize
    osz = jnp.zeros((), out_dtype).dtype.itemsize

    # Layout plumbing: contiguous reshapes only (free), no transposes, NO dtype casts
    # of the big arrays in the wrapper.
    g_flat = g_nchw.reshape(N, Cin, Sg)
    wc = conv_weight.reshape(Cout, Cin)
    bias = conv_bias.reshape(Cout, 1)

    vmem_limit = _vmem_limit_bytes()
    tile_budget = int(vmem_limit * 0.7)   # headroom for residents / double buffering
    cparams = pltpu.CompilerParams(
        dimension_semantics=("parallel", "parallel"),
        vmem_limit_bytes=vmem_limit,
    )

    # ---- kernel 1: 1x1 conv on the coarse map, tiled over flattened spatial ----------
    per_s = 2 * (Cin * gsz + Cout * ysz)                  # double-buffered bytes / lane
    ts_cap = max(128, tile_budget // max(per_s, 1))
    tS = _pick_tile(Sg, min(s_tile_max, ts_cap), 128)
    if N * (Sg // tS) < 2:                                # keep >=2 steps for v7x 2xTC
        ts_alt = _pick_tile(Sg, max(Sg // 2, 1), 128)
        if Sg // ts_alt >= 2:
            tS = ts_alt
    nS = Sg // tS

    cost1 = pl.CostEstimate(
        flops=2 * N * Cout * Cin * Sg + N * Cout * Sg,
        transcendentals=0,
        bytes_accessed=(N * Cin * Sg * gsz + Cout * Cin * wc.dtype.itemsize
                        + Cout * bias.dtype.itemsize + N * Cout * Sg * ysz))

    y = pl.pallas_call(
        _conv1x1_kernel,
        out_shape=jax.ShapeDtypeStruct((N, Cout, Sg), y_dtype),
        grid_spec=pltpu.PrefetchScalarGridSpec(
            num_scalar_prefetch=0,
            grid=(N, nS),
            in_specs=[
                pl.BlockSpec((1, Cin, tS), lambda n, s: (n, 0, s)),
                pl.BlockSpec((Cout, Cin), lambda n, s: (0, 0)),
                pl.BlockSpec((Cout, 1), lambda n, s: (0, 0)),
            ],
            out_specs=pl.BlockSpec((1, Cout, tS), lambda n, s: (n, 0, s)),
        ),
        compiler_params=cparams,
        cost_estimate=cost1,
    )(g_flat, wc, bias)

    # ---- kernel 2: separable bilinear resize + residual add, tiled over Hf -----------
    y4 = y.reshape(N, Cout, Hg, Wg)                       # free contiguous split
    ih = _interp_matrix_1d(Hf, Hg)                        # (Hf, Hg) f32
    iwt = _interp_matrix_1d(Wf, Wg).T                     # (Wg, Wf) f32

    sub_mult = {4: 8, 2: 16, 1: 32}.get(osz, 8)           # sublane multiple per dtype
    per_h = 2 * (Cout * Wf * (fsz + osz) + Hg * 4)        # streamed bytes per Hf row
    resident = 2 * Cout * Hg * Wg * ysz + Wg * Wf * 4
    th_cap = max(sub_mult, (tile_budget - resident) // max(per_h, 1))
    tHf = _pick_tile(Hf, min(hf_tile_max, th_cap), sub_mult)
    if N * (Hf // tHf) < 2:                               # keep >=2 steps for v7x 2xTC
        th_alt = _pick_tile(Hf, max(Hf // 2, 1), sub_mult)
        if Hf // th_alt >= 2:
            tHf = th_alt
    nHf = Hf // tHf

    cost2 = pl.CostEstimate(
        flops=2 * N * Cout * Hf * Hg * Wg + 2 * N * Cout * Hf * Wg * Wf
              + N * Cout * Hf * Wf,
        transcendentals=0,
        bytes_accessed=(N * Cout * Hg * Wg * ysz + Hf * Hg * 4 + Wg * Wf * 4
                        + N * Cout * Hf * Wf * (fsz + osz)))

    out = pl.pallas_call(
        _resize_add_kernel,
        out_shape=jax.ShapeDtypeStruct((N, Cout, Hf, Wf), out_dtype),
        grid_spec=pltpu.PrefetchScalarGridSpec(
            num_scalar_prefetch=0,
            grid=(N, nHf),
            in_specs=[
                pl.BlockSpec((1, Cout, Hg, Wg), lambda n, i: (n, 0, 0, 0)),
                pl.BlockSpec((tHf, Hg), lambda n, i: (i, 0)),
                pl.BlockSpec((Wg, Wf), lambda n, i: (0, 0)),
                pl.BlockSpec((1, Cout, tHf, Wf), lambda n, i: (n, 0, i, 0)),
            ],
            out_specs=pl.BlockSpec((1, Cout, tHf, Wf), lambda n, i: (n, 0, i, 0)),
        ),
        compiler_params=cparams,
        cost_estimate=cost2,
    )(y4, ih, iwt, f_nchw)

    return out


# ----------------------------------------------------------------------------- reference
def _reference_forward(g_nchw, f_nchw, conv_weight, conv_bias):
    """Pure-JAX reference (same math, no Pallas) for a sanity check."""
    N, Cin, Hg, Wg = g_nchw.shape
    _, Cout, Hf, Wf = f_nchw.shape
    wc = conv_weight.reshape(Cout, Cin)
    y = jnp.einsum('nchw,oc->nohw', g_nchw, wc) + conv_bias[None, :, None, None]
    ih = _interp_matrix_1d(Hf, Hg)
    iw = _interp_matrix_1d(Wf, Wg)
    z = jnp.einsum('Hh,nchw,Ww->ncHW', ih, y, iw)
    return z + f_nchw


if __name__ == "__main__":
    # inputPrevG is the coarser feature map (half the spatial size of inputF), as in FOTS.
    N, Cin, Cout = 2, 16, 8
    Hg, Wg = 16, 64
    Hf, Wf = 32, 128

    key = jax.random.PRNGKey(0)
    kg, kf, kw, kb = jax.random.split(key, 4)
    g = jax.random.normal(kg, (N, Cin, Hg, Wg), dtype=jnp.float32)
    f = jax.random.normal(kf, (N, Cout, Hf, Wf), dtype=jnp.float32)
    # Synthetic parameters with nn.Conv2d(Cin, Cout, kernel_size=1) shapes.
    conv_weight = jax.random.normal(kw, (Cout, Cin, 1, 1), dtype=jnp.float32) * 0.1
    conv_bias = jax.random.normal(kb, (Cout,), dtype=jnp.float32) * 0.1

    ref = _reference_forward(g, f, conv_weight, conv_bias)

    # 1) small explicit tile caps so the test exercises multi-tile grids on both kernels
    out_small = hlayer_forward(g, f, conv_weight, conv_bias,
                               s_tile_max=256, hf_tile_max=8)
    jax.block_until_ready(out_small)
    # 2) default (production-sized, VMEM-budgeted) tiles
    out_big = hlayer_forward(g, f, conv_weight, conv_bias)
    jax.block_until_ready(out_big)

    for out in (out_small, out_big):
        assert out.shape == (N, Cout, Hf, Wf)
        assert out.dtype == f.dtype
        assert jnp.allclose(out, ref, atol=2e-3, rtol=2e-3)

    print("KERNEL_OK")
</pallas_src>

<mosaic_0001>
module attributes {stable_mosaic.version = 11 : i64} {
  func.func @_conv1x1_kernel(%arg0: i32, %arg1: i32, %arg2: memref<1x16x256xf32, #tpu.memory_space<vmem>>, %arg3: memref<8x16xf32, #tpu.memory_space<vmem>>, %arg4: memref<8x1xf32, #tpu.memory_space<vmem>>, %arg5: memref<1x8x256xf32, #tpu.memory_space<vmem>>) attributes {dimension_semantics = [#tpu.dimension_semantics<parallel>, #tpu.dimension_semantics<parallel>], iteration_bounds = array<i64: 2, 4>, scalar_prefetch = 0 : i64, scratch_operands = 0 : i64, tpu.core_type = #tpu.core_type<tc>, window_params = [{transform_indices = @transform_0, window_bounds = array<i64: 1, 16, 256>}, {pipeline_mode = #tpu.pipeline_mode<synchronous>, transform_indices = @transform_1, window_bounds = array<i64: 8, 16>}, {pipeline_mode = #tpu.pipeline_mode<synchronous>, transform_indices = @transform_2, window_bounds = array<i64: 8, 1>}, {transform_indices = @transform_3, window_bounds = array<i64: 1, 8, 256>}]} {
    %c0 = arith.constant 0 : index
    %c0_0 = arith.constant 0 : index
    %0 = vector.load %arg3[%c0, %c0_0] : memref<8x16xf32, #tpu.memory_space<vmem>>, vector<8x16xf32>
    %c0_1 = arith.constant 0 : index
    %c0_2 = arith.constant 0 : index
    %c0_3 = arith.constant 0 : index
    %1 = vector.load %arg2[%c0_1, %c0_2, %c0_3] : memref<1x16x256xf32, #tpu.memory_space<vmem>>, vector<1x16x256xf32>
    %2 = vector.shape_cast %1 : vector<1x16x256xf32> to vector<16x256xf32>
    %cst = arith.constant dense<0.000000e+00> : vector<8x256xf32>
    %3 = tpu.matmul %0, %2, %cst {dimension_numbers = #tpu.dot_dimension_numbers<[1], [0], [0], [1], [0, 0, 1, 1], [], []>} : vector<8x16xf32>, vector<16x256xf32>, vector<8x256xf32> -> vector<8x256xf32>
    %c0_4 = arith.constant 0 : index
    %c0_5 = arith.constant 0 : index
    %4 = vector.load %arg4[%c0_4, %c0_5] : memref<8x1xf32, #tpu.memory_space<vmem>>, vector<8x1xf32>
    %5 = vector.broadcast %4 : vector<8x1xf32> to vector<8x256xf32>
    %6 = arith.addf %3, %5 : vector<8x256xf32>
    %c0_6 = arith.constant 0 : index
    %c0_7 = arith.constant 0 : index
    %c0_8 = arith.constant 0 : index
    %7 = vector.load %arg5[%c0_6, %c0_7, %c0_8] : memref<1x8x256xf32, #tpu.memory_space<vmem>>, vector<1x8x256xf32>
    %8 = vector.shape_cast %7 : vector<1x8x256xf32> to vector<8x256xf32>
    %9 = vector.shape_cast %6 : vector<8x256xf32> to vector<1x8x256xf32>
    tpu.vector_store %arg5[%c0_6, %c0_7, %c0_8], %9 {strides = array<i32>} : memref<1x8x256xf32, #tpu.memory_space<vmem>>, vector<1x8x256xf32>,
    return
  }
  func.func @transform_0(%arg0: i32, %arg1: i32) -> (i32, i32, i32) {
    %c0_i32 = arith.constant 0 : i32
    %c0_i32_0 = arith.constant 0 : i32
    return %arg0, %c0_i32, %arg1 : i32, i32, i32
  }
  func.func @transform_1(%arg0: i32, %arg1: i32) -> (i32, i32) {
    %c0_i32 = arith.constant 0 : i32
    %c0_i32_0 = arith.constant 0 : i32
    %c0_i32_1 = arith.constant 0 : i32
    return %c0_i32, %c0_i32_0 : i32, i32
  }
  func.func @transform_2(%arg0: i32, %arg1: i32) -> (i32, i32) {
    %c0_i32 = arith.constant 0 : i32
    %c0_i32_0 = arith.constant 0 : i32
    %c0_i32_1 = arith.constant 0 : i32
    return %c0_i32, %c0_i32_0 : i32, i32
  }
  func.func @transform_3(%arg0: i32, %arg1: i32) -> (i32, i32, i32) {
    %c0_i32 = arith.constant 0 : i32
    %c0_i32_0 = arith.constant 0 : i32
    return %arg0, %c0_i32, %arg1 : i32, i32, i32
  }
}

</mosaic_0001>

<bundles_post_ra>
// kernel: tpu_custom_call.1
= control target key start
LH: loop header
LB: loop body
LE: loop exit
PB: predicated region body
PF: predicated region fallthrough
CT: control target
= control target key end

     0   :  { %8 = vsyncpa [#allocation3], 0  ;;  %s817_s0 = inlined_call_operand.hbm [shape: f32[2,16,1024], index: 0, kind: input, shape index: {}]   ;;  %s818_s1 = inlined_call_operand.vmem [shape: f32[8,16], index: 1, kind: input, shape index: {}]   ;;  %s819_s2 = inlined_call_operand.vmem [shape: f32[8,1], index: 2, kind: input, shape index: {}]   ;;  %s820_s3 = inlined_call_operand.hbm [shape: f32[2,8,1024], index: 3, kind: output, shape index: {}]  }
   0x1   :  { %10 = vsyncpa [#allocation3 + $0x1], 0 }
   0x2   :  { %11 = vsyncpa [#allocation4], 0 }
   0x3   :  { %13 = vsyncpa [#allocation4 + $0x1], 0  ;;  %s656_s12 = smov 0   ;;  %s658_s13 = smov 0  }
   0x4   :  { %s660_s14 = smov 0   ;;  %s662_s15 = smov 0  }
   0x5   :  { %s664_s16 = smov 0   ;;  %s666_s17 = smov 0  }
   0x6   :  { %s668_s18 = smov 0   ;;  %s670_s19 = smov 0  }
   0x7 LB: > { %s401_s20 = sadd.s32 4294967295, %s627_s19   ;;  %s402_s21 = sadd.s32 4294967294, %s627_s19   ;;  %s627_s19 = sphi %s670_s19, %s19_s19   ;;  %s623_s18 = sphi %s668_s18, %s838_s18   ;;  %s619_s17 = sphi %s666_s17, %s837_s17   ;;  %s615_s16 = sphi %s664_s16, %s836_s16   ;;  %s611_s15 = sphi %s662_s15, %s835_s15   ;;  %s607_s14 = sphi %s660_s14, %s834_s14   ;;  %s603_s13 = sphi %s658_s13, %s833_s13   ;;  %s599_s12 = sphi %s656_s12, %s832_s12  }
   0x8   : > { %s28_s22 = sadd.s32 1, %s619_s17  ;;  %s31_s23 = sadd.s32 1, %s623_s18 }
   0x9   : > { %p29_p0 = scmp.ge.s32.totalorder %s28_s22, 4  ;;  %s40_s24 = sadd.s32 1, %s607_s14 }
   0xa   : > { %p47_p1 = scmp.ne.s32.totalorder %s607_s14, %s603_s13  ;;  %p48_p2 = scmp.eq.s32.totalorder %s627_s19, 0 }
   0xb   : > { %s840_s22 = smov (%p29_p0, %s28_s22), 0  ;;  %s842_s23 = smov (!%p29_p0, %s31_s23), %s623_s18 }
   0xc   : > { %823 = sst [smem:[#allocation8_spill]] %s840_s22  ;;  %s36_s25 = ssub.s32 %s619_s17, %s840_s22 }
   0xd   : > { %p709_p3 = por %p48_p2, %p47_p1  ;;  %p33_p4 = scmp.ge.s32.totalorder %s842_s23, 2 }
   0xe   : > { %p53_p5 = scmp.ne.s32.totalorder %s603_s13, %s599_s12  ;;  %p54_p6 = scmp.eq.s32.totalorder %s401_s20, 0 }
   0xf   : > { %p121_p7 = scmp.eq.s32.totalorder %s401_s20, 7  ;;  %s844_s23 = smov (%p33_p4, %s842_s23), 0 }
  0x10   : > { %825 = sst [smem:[#allocation9_spill]] %s844_s23  ;;  %p717_p8 = por %p54_p6, %p53_p5 }
  0x11   : > { %p721_p9 = por %p121_p7, %p47_p1  ;;  %s35_s29 = ssub.s32 %s623_s18, %s844_s23 }
  0x12   : > { %p127_p10 = scmp.eq.s32.totalorder %s402_s21, 7  ;;  %s37_s30 = sor.u32 %s36_s25, %s35_s29 }
  0x13   : > { %p38_p11 = scmp.eq.s32.totalorder %s37_s30, 0  ;;  %p431_p13 = scmp.lt.s32.totalorder %s627_s19, 8 }
  0x14   : > { %p727_p12 = por %p127_p10, %p53_p5  ;;  %s153_s5 = sand.u32 1, %s607_s14  }
  0x15   : > { %s734_s6 = scalar_select %p38_p11, %s607_s14, %s40_s24  }
  0x16   : > { %s405_s7 = sshll.u32 %s153_s5, 5  ;;  %s406_s8 = sshll.u32 %s619_s17, 1 }
  0x17   : > { %s407_s9 = sshll.u32 %s623_s18, 4  ;;  %s157_s10 = scalar_lea.vmem [#allocation2], %s405_s7 }
  0x18   : > { %s166_s11 = sshll.u32 %s157_s10, 4  ;;  %s163_s20 = sadd.s32 %s407_s9, %s406_s8  ;;  %s167_s11 = int_to_ptr.vmem [resolvable:$true] %s166_s11 }
  0x19   : > { %s408_s23 = sshll.u32 %s163_s20, 7  ;;  %p740_p0 = pnand %p431_p13, %p709_p3 }
  0x1a   : > { %s165_s30 = scalar_lea.hbm %s817_s0, %s408_s23  ;;  %p409_p1 = scmp.ge.s32.totalorder %s627_s19, 1 }
  0x1b   : > { %s154_s24 = scalar_lea.sflag [#allocation3], %s153_s5  ;;  %p505_p2 = pneg %p740_p0 }
  0x1c   : > { %s516_s22 = scalar_lea.vmem %s167_s11, 512  ;;  %s629_s7 = smov [#allocation2]  }
  0x1d   : > { %p517_p4 = scmp.ne.s32.totalorder %s167_s11, %s516_s22  ;;  %s521_s8 = sshll.u32 %s629_s7, 4  ;;  %s522_s8 = int_to_ptr.vmem [resolvable:$false] %s521_s8 }
  0x1e   : > { %s523_s26 = scalar_lea.vmem %s522_s8, 1024  ;;  %p524_p3 = scmp.lt.s32.totalorder %s167_s11, %s522_s8 }
  0x1f   : > { %p519_p5 = pnand %p517_p4, %p505_p2  ;;  %p525_p7 = scmp.lt.s32.totalorder %s523_s26, %s516_s22 }
  0x21   : > { %p520_p6 = pneg %p519_p5  ;;  %p526_p10 = por %p525_p7, %p524_p3 }
  0x23   : > { %p527_p11 = pnand %p526_p10, %p520_p6 }
  0x25   : > { %530 = shalt.err (!%p527_p11)
}
  0x26   : > { %s630_s9 = smov 1024   ;;  %s631_s23 = smov 256  }
  0x27   : > { %s632_s5 = smov 16   ;;  %p174_p13 = scmp.lt.s32.totalorder %s627_s19, 9 }
  0x28   : > { %426 = dma.hbm_to_vmem [thread:$0]  (!%p740_p0), %s165_s30, 512, %s167_s11, %s154_s24, %s630_s9, %s631_s23, %s632_s5  }
  0x29   : > { %p175_p2 = pnand %p409_p1, %p174_p13 }
  0x2a   : > { %s756_s10 = sand.u32 (!%p175_p2), 1, %s603_s13  }
  0x2b   : > { %178 = sbr.rel (%p175_p2) target bundleno = 265 (0x109), region = 32  ;;  %s410_s22 = sshll.u32 (!%p175_p2), %s756_s10, 5 }
  0x2c   : > { %s181_s20 = scalar_lea.sflag (!%p175_p2), [#allocation3], %s756_s10  ;;  %s184_s25 = scalar_lea.vmem (!%p175_p2), [#allocation2], %s410_s22 }
  0x30   : > { %590 = dma.done.wait (%p717_p8), %s181_s20, 512  }
  0x31   : > { %592 = vsyncadd (%p717_p8), %s181_s20, 4294966784  ;;  %v633_v0 = vmov 0.0   ;;  %v634_v1 = vmov 0   ;;  %v213_v2 = vld [vmem:[%s184_s25 + $0x18] sm:$0xff]  ;;  %v212_v3 = vld [vmem:[%s184_s25 + $0x10] sm:$0xff]  ;;  %vm220_vm0 = vcmask 130048  }
  0x32   : > { %288 = vmatprep.mubr.f32.mxu0 %v633_v0  ;;  %502 = vset.pattern.permute.xlu0 %v634_v1  ;;  %v211_v4 = vld [vmem:[%s184_s25 + $0x8] sm:$0xff]  ;;  %v210_v5 = vld [vmem:[%s184_s25] sm:$0xff]  ;;  %s411_s30 = sshll.u32 %s756_s10, 4  ;;  %s414_s24 = sshll.u32 %s611_s15, 1 }
  0x33   : > { %252 = vmatprep.subr.mxu0 %v213_v2  ;;  %v214_v6 = vld [vmem:[%s819_s2] sm:$0xff]  ;;  %s415_s7 = sshll.u32 %s615_s16, 3  ;;  %s206_s9 = scalar_lea.vmem [#allocation5], %s411_s30 }
  0x34   : > { %253 = vmatpush1.msra.mxu0 %v212_v3  ;;  %v209_v7 = vld [vmem:[%s818_s1] sm:$0xff]  ;;  %217 = vperm.xlu0 %502, %v214_v6   ;;  %s310_s8 = sadd.s32 %s415_s7, %s414_s24  ;;  %s314_s23 = sshll.u32 %s206_s9, 4  ;;  %s315_s23 = int_to_ptr.vmem [resolvable:$true] %s314_s23 }
  0x35   : > { %254 = vmatprep.subr.mxu0 %v211_v4  ;;  %s416_s26 = sshll.u32 %s310_s8, 7  ;;  %s298_s25 = scalar_lea.sflag [#allocation4], %s756_s10 }
  0x36   : > { %255 = vmatpush1.msra.mxu0 %v210_v5  ;;  %s312_s20 = scalar_lea.hbm %s820_s3, %s416_s26  ;;  %s531_s15 = scalar_lea.vmem %s315_s23, 256 }
  0x37   : > { %412 = vmatmul.mubr.msk.f32.vlgmr.msra.gmra.mxu0 %vm220_vm0, %v209_v7  ;;  %p532_p8 = scmp.ne.s32.totalorder %s315_s23, %s531_s15  ;;  %s635_s16 = smov [#allocation5]  }
  0x38   : > { %s535_s11 = sshll.u32 %s635_s16, 4  ;;  %s536_s11 = int_to_ptr.vmem [resolvable:$false] %s535_s11 }
  0x39   : > { %p533_p0 = pnand %p532_p8, %p721_p9  ;;  %s537_s21 = scalar_lea.vmem %s536_s11, 512 }
  0x3a   : > { %p538_p4 = scmp.lt.s32.totalorder %s315_s23, %s536_s11  ;;  %p539_p5 = scmp.lt.s32.totalorder %s537_s21, %s531_s15 }
  0x3b   : > { %p534_p1 = pneg %p533_p0 }
  0x3c   : > { %p540_p6 = por %p539_p5, %p538_p4 }
  0x3e   : > { %p541_p3 = pnand %p540_p6, %p534_p1 }
  0xaf   : > { %v218_v8 = vpop.permute.xlu0 %217 }
  0xf7   : > { %v290_v9 = vpop.f32.mrf.mxu0 }
  0xf8   : > { %v291_v10 = vadd.f32 %v290_v9, %v218_v8 }
  0xf9   : > { %v292_v11 = vpop.f32.mrf.mxu0 }
  0xfa   : > { %295 = vst [vmem:[%s206_s9] sm:$0xff] %v291_v10  ;;  %v293_v12 = vadd.f32 %v292_v11, %v218_v8 }
  0xfc   : > { %296 = vst [vmem:[%s206_s9 + $0x8] sm:$0xff] %v293_v12 }
  0xfd   : > { %544 = shalt.err (!%p541_p3)
}
  0xfe   : > { %s545_s29 = scalar_lea.hbm %s312_s20, 256  ;;  %s549_s30 = scalar_lea.hbm %s820_s3, 2048 }
  0xff   : > { %p546_p7 = scmp.ne.s32.totalorder %s312_s20, %s545_s29  ;;  %p550_p13 = scmp.lt.s32.totalorder %s312_s20, %s820_s3 }
 0x100   : > { %p551_p2 = scmp.lt.s32.totalorder %s549_s30, %s545_s29 }
 0x101   : > { %p547_p10 = pnand %p546_p7, %p721_p9 }
 0x102   : > { %p552_p8 = por %p551_p2, %p550_p13 }
 0x103   : > { %p548_p11 = pneg %p547_p10 }
 0x105   : > { %p553_p0 = pnand %p552_p8, %p548_p11 }
 0x107   : > { %556 = shalt.err (!%p553_p0)
}
 0x108   : > { %421 = dma.vmem_to_hbm [thread:$0]  (%p721_p9), %s315_s23, 256, %s312_s20, %s298_s25  }
 0x109 PF: > { %p432_p1 = scmp.ge.s32.totalorder %s627_s19, 2  ;;  %s326_s8 = sand.u32 1, %s599_s12  }
 0x10a   : > { %s327_s26 = scalar_lea.sflag [#allocation4], %s326_s8 }
 0x10b   : > { %p428_p4 = pnand %p432_p1, %p727_p12 }
 0x10d   : > { %p429_p5 = pneg %p428_p4 }
 0x10f   : > { %594 = dma.done.wait (%p429_p5), %s327_s26, 256  }
 0x110   : > { %596 = vsyncadd (%p429_p5), %s327_s26, 4294967040  ;;  %s19_s19 = sadd.s32 1, %s627_s19   ;;  %s830_s28 = sld [smem:[#allocation8_spill]] }
 0x111   : > { %p16_p6 = scmp.ge.s32.totalorder %s19_s19, 10   ;;  %s831_s9 = sld [smem:[#allocation9_spill]] }
 0x112   : > { %s832_s12 = smov %s603_s13  ;;  %s833_s13 = smov %s607_s14 }
 0x113   : > { %s834_s14 = smov %s734_s6  ;;  %s835_s15 = smov %s619_s17 }
 0x114   : > { %s836_s16 = smov %s623_s18  ;;  %18 = sbr.rel (!%p16_p6) target bundleno = 7 (0x7), region = 77 }
 0x116   : > { %s837_s17 = smov %s830_s28 }
 0x117   : > { %s838_s18 = smov %s831_s9 }
 0x119   :  { %332 = vsyncpa [#allocation3], 1 }
 0x11a   :  { %334 = vsyncpa [#allocation3 + $0x1], 1 }
 0x11b   :  { %335 = vsyncpa [#allocation4], 1 }
 0x11c   :  { %337 = vsyncpa [#allocation4 + $0x1], 1 }

</bundles_post_ra>
